<compile_context>
chip_gen: v7x
topology: tpu7x:2x2x1
jax: 0.10.0
libtpu: 0.0.40
codegen_flags: <defaults>
</compile_context>

<pallas_src>
import functools

import jax
import jax.numpy as jnp
from jax.experimental import pallas as pl
from jax.experimental.pallas import tpu as pltpu


def _round_up(x, m):
    return (x + m - 1) // m * m


def default_config():
    """Per-generation tile / scoped-VMEM presets (conservative fallback)."""
    try:
        kind = jax.devices()[0].device_kind.lower()
    except Exception:
        kind = ""
    if ("v5" in kind) or ("v6" in kind):
        # 128 MiB physical VMEM, slower HBM: go big, raise the scoped limit.
        return dict(b_tile=512, v_tile=8192, vmem_limit_bytes=96 * 1024 * 1024)
    if ("v2" in kind) or ("v3" in kind) or ("v4" in kind):
        # Older parts: modest tiles, keep the compiler's default scoped limit.
        return dict(b_tile=256, v_tile=2048, vmem_limit_bytes=None)
    # v7x / unknown: only 64 MiB physical VMEM -> leave headroom.
    return dict(b_tile=512, v_tile=4096, vmem_limit_bytes=48 * 1024 * 1024)


def _cparams(dims, vmem_limit_bytes):
    if vmem_limit_bytes is None:
        return pltpu.CompilerParams(dimension_semantics=dims)
    return pltpu.CompilerParams(dimension_semantics=dims,
                                vmem_limit_bytes=vmem_limit_bytes)


# --------------------------------------------------------------------------
# Kernel 1: beta logits in lane-dense (K, V) layout + online softmax stats.
# Grid is (n_par, nv_inner): the leading axis splits V in halves so both
# TensorCores can run it on v7x; each half emits its own (m, l) partial.
#   logit[k, v] = sum_r alpha^T[k, r] * rho^T[r, v]     (pad cols -> -1e30)
#   m_p[k] = max_v logit, l_p[k] = sum_v exp(logit - m_p)   within the half
# --------------------------------------------------------------------------
def beta_logits_kernel(alpha_t_ref, rho_t_ref, logit_ref, m_ref, l_ref,
                       m_sc, l_sc, *, v_true):
    v = pl.program_id(1)

    @pl.when(v == 0)
    def _():
        m_sc[...] = jnp.full_like(m_sc, -jnp.inf)
        l_sc[...] = jnp.zeros_like(l_sc)

    logit = jnp.dot(alpha_t_ref[...], rho_t_ref[...],
                    preferred_element_type=jnp.float32)       # (K, Vt), lane-dense
    if v_true is not None:
        # Mask padded vocab columns so they never contribute to the softmax.
        v_tile = logit_ref.shape[-1]
        col0 = (pl.program_id(0) * pl.num_programs(1) + v) * v_tile
        cols = col0 + jax.lax.broadcasted_iota(jnp.int32, logit.shape, 1)
        logit = jnp.where(cols < v_true, logit, jnp.float32(-1e30))
    logit_ref[...] = logit

    m_prev = m_sc[...]                                        # (K, 1)
    m_new = jnp.maximum(m_prev, jnp.max(logit, axis=-1, keepdims=True))
    l_sc[...] = (l_sc[...] * jnp.exp(m_prev - m_new)
                 + jnp.sum(jnp.exp(logit - m_new), axis=-1, keepdims=True))
    m_sc[...] = m_new

    @pl.when(v == pl.num_programs(1) - 1)
    def _():
        m_ref[...] = m_sc[...]
        l_ref[...] = l_sc[...]


# --------------------------------------------------------------------------
# Kernel 1b: normalize logits into beta once (removes exp / m / l from the
# per-batch-tile decode loop).  Merges the per-half (m, l) partials with a
# 2-element logsumexp combine (tiny, K elements).
#   beta[k, v] = exp(logit[k, v] - m[k]) / l[k]
# --------------------------------------------------------------------------
def beta_normalize_kernel(logit_ref, m_part_ref, l_part_ref, beta_ref,
                          *, num_topics):
    K = num_topics
    n_par = m_part_ref.shape[0] // K
    if n_par == 1:
        m = m_part_ref[...]                                   # (K, 1)
        l = l_part_ref[...]
    else:  # n_par == 2
        m0 = m_part_ref[:K, :]
        m1 = m_part_ref[K:, :]
        l0 = l_part_ref[:K, :]
        l1 = l_part_ref[K:, :]
        m = jnp.maximum(m0, m1)
        l = l0 * jnp.exp(m0 - m) + l1 * jnp.exp(m1 - m)
    beta_ref[...] = jnp.exp(logit_ref[...] - m) * (1.0 / l)


# --------------------------------------------------------------------------
# Kernel 2: encoder.  V is a reduction grid axis (accumulate nbows @ w1),
# finalize with tanh MLP, fused (mu|logsigma) projection, theta softmax and
# per-document KL.
# --------------------------------------------------------------------------
def encode_kernel(nbows_ref, w1_ref, b1_ref, w2_ref, b2_ref, wmuls_ref,
                  bmuls_ref, theta_ref, kl_ref, acc_ref, *, num_topics):
    v = pl.program_id(1)

    @pl.when(v == 0)
    def _():
        acc_ref[...] = jnp.zeros_like(acc_ref)

    acc_ref[...] += jnp.dot(nbows_ref[...], w1_ref[...],
                            preferred_element_type=jnp.float32)   # (Bt, H)

    @pl.when(v == pl.num_programs(1) - 1)
    def _():
        h1 = jnp.tanh(acc_ref[...] + b1_ref[...])
        h2 = jnp.tanh(jnp.dot(h1, w2_ref[...],
                              preferred_element_type=jnp.float32) + b2_ref[...])
        # fused mu | logsigma projection: one (H, 2K) matmul, then static slice
        muls = jnp.dot(h2, wmuls_ref[...],
                       preferred_element_type=jnp.float32) + bmuls_ref[...]
        mu = muls[:, :num_topics]
        logsigma = muls[:, num_topics:]

        # per-document KL( q(theta) || N(0, I) )
        kl_ref[...] = -0.5 * jnp.sum(
            1.0 + logsigma - mu * mu - jnp.exp(logsigma),
            axis=-1, keepdims=True)

        # theta = softmax(mu) (eval mode: z == mu)
        z = mu - jnp.max(mu, axis=-1, keepdims=True)
        ez = jnp.exp(z)
        theta_ref[...] = ez * (1.0 / jnp.sum(ez, axis=-1, keepdims=True))


# --------------------------------------------------------------------------
# Kernel 3: decode + per-document reconstruction loss, streaming V tiles.
# bows arrives as bf16 (lossless for integer counts) and is widened in-kernel.
#   recon_b = -sum_v log(theta @ beta + 1e-6)[b, v] * bows[b, v]
# --------------------------------------------------------------------------
def decode_kernel(theta_ref, bows_ref, beta_ref, recon_ref, acc_ref):
    v = pl.program_id(1)

    @pl.when(v == 0)
    def _():
        acc_ref[...] = jnp.zeros_like(acc_ref)

    res = jnp.dot(theta_ref[...], beta_ref[...],
                  preferred_element_type=jnp.float32)         # (Bt, Vt)
    preds = jnp.log(res + 1e-6)
    acc_ref[...] += -jnp.sum(preds * bows_ref[...].astype(jnp.float32),
                             axis=-1, keepdims=True)

    @pl.when(v == pl.num_programs(1) - 1)
    def _():
        recon_ref[...] = acc_ref[...]


# --------------------------------------------------------------------------
# One-time parameter prep (hoisted out of the per-call path): transposes,
# mu|logsigma fusion, vocab-dim padding of w1 / rho^T.
# --------------------------------------------------------------------------
def prepare_params(params, *, v_tile=None):
    if v_tile is None:
        v_tile = default_config()["v_tile"]
    w1, b1, w2, b2, wmu, bmu, wls, bls, rho, alpha = params
    V, H = w1.shape
    K = wmu.shape[1]
    R = rho.shape[1]

    v_tile = min(v_tile, _round_up(V, 128))
    V_pad = _round_up(V, v_tile)

    wmuls = jnp.concatenate([wmu, wls], axis=1)       # (H, 2K)
    bmuls = jnp.concatenate([bmu, bls], axis=1)       # (1, 2K)
    alpha_t = jnp.asarray(alpha.T)                    # (K, R)
    rho_t = jnp.asarray(rho.T)                        # (R, V)

    w1p = w1
    if V_pad != V:
        w1p = jnp.pad(w1, ((0, V_pad - V), (0, 0)))
        rho_t = jnp.pad(rho_t, ((0, 0), (0, V_pad - V)))

    return dict(w1=w1p, b1=b1, w2=w2, b2=b2, wmuls=wmuls, bmuls=bmuls,
                alpha_t=alpha_t, rho_t=rho_t,
                V=V, V_pad=V_pad, v_tile=v_tile, H=H, K=K, R=R)


# --------------------------------------------------------------------------
# Forward wrapper
# --------------------------------------------------------------------------
def etm_forward(bows, nbows, prep, *, b_tile=None, vmem_limit_bytes=None):
    cfg = default_config()
    if b_tile is None:
        b_tile = cfg["b_tile"]
    if vmem_limit_bytes is None:
        vmem_limit_bytes = cfg["vmem_limit_bytes"]

    B, V = bows.shape
    assert V == prep["V"], "vocab size mismatch with prepared params"
    V_pad, v_tile = prep["V_pad"], prep["v_tile"]
    H, K, R = prep["H"], prep["K"], prep["R"]
    f32 = jnp.float32

    b_tile = min(b_tile, _round_up(B, 8))
    B_pad = _round_up(B, b_tile)

    # Pad the activation streams to the tile grid (zeros contribute nothing to
    # the encoder matmul or the recon loss; pad rows are dropped at the end).
    if (B_pad != B) or (V_pad != V):
        bows_p = jnp.pad(bows, ((0, B_pad - B), (0, V_pad - V)))
        nbows_p = jnp.pad(nbows, ((0, B_pad - B), (0, V_pad - V)))
    else:
        bows_p, nbows_p = bows, nbows
    # bag-of-words counts are small integers -> exact in bf16; halves the
    # dominant HBM stream of the decode kernel.
    bows_bf16 = bows_p.astype(jnp.bfloat16)

    nv = V_pad // v_tile
    nb = B_pad // b_tile
    n_par = 2 if (nv % 2 == 0 and nv >= 2) else 1     # 2-way V split for v7x TCs
    nv_inner = nv // n_par

    # ---- kernel 1: beta logits (K, V) + per-half online-softmax stats ----
    logit, m_part, l_part = pl.pallas_call(
        functools.partial(beta_logits_kernel,
                          v_true=(V if V_pad != V else None)),
        out_shape=(
            jax.ShapeDtypeStruct((K, V_pad), f32),
            jax.ShapeDtypeStruct((n_par * K, 1), f32),
            jax.ShapeDtypeStruct((n_par * K, 1), f32),
        ),
        grid_spec=pltpu.PrefetchScalarGridSpec(
            num_scalar_prefetch=0,
            grid=(n_par, nv_inner),
            in_specs=[
                pl.BlockSpec((K, R), lambda p, v: (0, 0)),
                pl.BlockSpec((R, v_tile), lambda p, v: (0, p * nv_inner + v)),
            ],
            out_specs=[
                pl.BlockSpec((K, v_tile), lambda p, v: (0, p * nv_inner + v)),
                pl.BlockSpec((K, 1), lambda p, v: (p, 0)),
                pl.BlockSpec((K, 1), lambda p, v: (p, 0)),
            ],
            scratch_shapes=[pltpu.VMEM((K, 1), f32), pltpu.VMEM((K, 1), f32)],
        ),
        compiler_params=_cparams(("parallel", "arbitrary"), vmem_limit_bytes),
    )(prep["alpha_t"], prep["rho_t"])

    # ---- kernel 1b: normalize once into beta (pad columns -> exactly 0) ----
    beta = pl.pallas_call(
        functools.partial(beta_normalize_kernel, num_topics=K),
        out_shape=jax.ShapeDtypeStruct((K, V_pad), f32),
        grid_spec=pltpu.PrefetchScalarGridSpec(
            num_scalar_prefetch=0,
            grid=(nv,),
            in_specs=[
                pl.BlockSpec((K, v_tile), lambda v: (0, v)),
                pl.BlockSpec((n_par * K, 1), lambda v: (0, 0)),
                pl.BlockSpec((n_par * K, 1), lambda v: (0, 0)),
            ],
            out_specs=pl.BlockSpec((K, v_tile), lambda v: (0, v)),
        ),
        compiler_params=_cparams(("parallel",), vmem_limit_bytes),
    )(logit, m_part, l_part)

    # ---- kernel 2: encoder (V reduction) + theta + per-doc KL ----
    theta, kl_doc = pl.pallas_call(
        functools.partial(encode_kernel, num_topics=K),
        out_shape=(
            jax.ShapeDtypeStruct((B_pad, K), f32),
            jax.ShapeDtypeStruct((B_pad, 1), f32),
        ),
        grid_spec=pltpu.PrefetchScalarGridSpec(
            num_scalar_prefetch=0,
            grid=(nb, nv),
            in_specs=[
                pl.BlockSpec((b_tile, v_tile), lambda b, v: (b, v)),  # nbows
                pl.BlockSpec((v_tile, H), lambda b, v: (v, 0)),       # w1
                pl.BlockSpec((1, H), lambda b, v: (0, 0)),            # b1
                pl.BlockSpec((H, H), lambda b, v: (0, 0)),            # w2
                pl.BlockSpec((1, H), lambda b, v: (0, 0)),            # b2
                pl.BlockSpec((H, 2 * K), lambda b, v: (0, 0)),        # wmu|wls
                pl.BlockSpec((1, 2 * K), lambda b, v: (0, 0)),        # bmu|bls
            ],
            out_specs=[
                pl.BlockSpec((b_tile, K), lambda b, v: (b, 0)),
                pl.BlockSpec((b_tile, 1), lambda b, v: (b, 0)),
            ],
            scratch_shapes=[pltpu.VMEM((b_tile, H), f32)],
        ),
        compiler_params=_cparams(("parallel", "arbitrary"), vmem_limit_bytes),
    )(nbows_p, prep["w1"], prep["b1"], prep["w2"], prep["b2"],
      prep["wmuls"], prep["bmuls"])

    # ---- kernel 3: decode + per-doc recon loss (streamed over V tiles) ----
    recon_doc = pl.pallas_call(
        decode_kernel,
        out_shape=jax.ShapeDtypeStruct((B_pad, 1), f32),
        grid_spec=pltpu.PrefetchScalarGridSpec(
            num_scalar_prefetch=0,
            grid=(nb, nv),
            in_specs=[
                pl.BlockSpec((b_tile, K), lambda b, v: (b, 0)),       # theta
                pl.BlockSpec((b_tile, v_tile), lambda b, v: (b, v)),  # bows bf16
                pl.BlockSpec((K, v_tile), lambda b, v: (0, v)),       # beta
            ],
            out_specs=pl.BlockSpec((b_tile, 1), lambda b, v: (b, 0)),
            scratch_shapes=[pltpu.VMEM((b_tile, 1), f32)],
        ),
        compiler_params=_cparams(("parallel", "arbitrary"), vmem_limit_bytes),
    )(theta, bows_bf16, beta)

    # Tiny final aggregation over real documents (pad rows dropped).
    recon = jnp.mean(recon_doc[:B, 0])
    kld = jnp.mean(kl_doc[:B, 0])
    return recon, kld


def etm_forward_ref(bows, nbows, params):
    """Plain-JAX reference for correctness checking."""
    w1, b1, w2, b2, wmu, bmu, wls, bls, rho, alpha = params
    h1 = jnp.tanh(nbows @ w1 + b1)
    h2 = jnp.tanh(h1 @ w2 + b2)
    mu = h2 @ wmu + bmu
    logsigma = h2 @ wls + bls
    kld = jnp.mean(-0.5 * jnp.sum(1 + logsigma - mu**2 - jnp.exp(logsigma), axis=-1))
    theta = jax.nn.softmax(mu, axis=-1)
    logit = rho @ alpha
    beta = jax.nn.softmax(logit, axis=0).T
    preds = jnp.log(theta @ beta + 1e-6)
    recon = jnp.mean(-jnp.sum(preds * bows, axis=1))
    return recon, kld


if __name__ == "__main__":
    def make_case(seed, B, V, H, K, R):
        key = jax.random.PRNGKey(seed)
        ks = jax.random.split(key, 12)
        f32 = jnp.float32
        # Deterministic synthetic parameters (shapes follow the module __init__).
        w1    = (0.05 * jax.random.normal(ks[0], (V, H))).astype(f32)   # q_theta[0]
        b1    = (0.05 * jax.random.normal(ks[1], (1, H))).astype(f32)
        w2    = (0.05 * jax.random.normal(ks[2], (H, H))).astype(f32)   # q_theta[2]
        b2    = (0.05 * jax.random.normal(ks[3], (1, H))).astype(f32)
        wmu   = (0.05 * jax.random.normal(ks[4], (H, K))).astype(f32)   # mu_q_theta
        bmu   = (0.05 * jax.random.normal(ks[5], (1, K))).astype(f32)
        wls   = (0.05 * jax.random.normal(ks[6], (H, K))).astype(f32)   # logsigma_q_theta
        bls   = (0.05 * jax.random.normal(ks[7], (1, K))).astype(f32)
        rho   = (0.05 * jax.random.normal(ks[8], (V, R))).astype(f32)   # rho.weight
        alpha = (0.05 * jax.random.normal(ks[9], (R, K))).astype(f32)   # alphas.weight.T
        params = (w1, b1, w2, b2, wmu, bmu, wls, bls, rho, alpha)
        counts = jax.random.poisson(ks[10], 2.0, (B, V)).astype(f32)
        counts = counts + (jnp.sum(counts, axis=1, keepdims=True) == 0)  # no empty docs
        bows = counts
        nbows = counts / jnp.sum(counts, axis=1, keepdims=True)
        return params, bows, nbows

    # Case 1: divisible shapes, multiple V tiles -> exercises the streaming
    # V-reduction, the 2-way parallel split of kernel 1 and the online softmax.
    params, bows, nbows = make_case(0, B=8, V=512, H=128, K=16, R=64)
    prep = prepare_params(params, v_tile=128)          # small tile to force nv > 1
    out = etm_forward(bows, nbows, prep)
    jax.block_until_ready(out)
    ref = etm_forward_ref(bows, nbows, params)
    assert jnp.allclose(out[0], ref[0], rtol=1e-4, atol=1e-4), (out[0], ref[0])
    assert jnp.allclose(out[1], ref[1], rtol=1e-4, atol=1e-4), (out[1], ref[1])

    # Case 2: non-divisible vocab -> exercises the padded tail tile and the
    # logit masking / zero-beta path.
    params2, bows2, nbows2 = make_case(1, B=8, V=500, H=128, K=16, R=64)
    prep2 = prepare_params(params2, v_tile=128)
    out2 = etm_forward(bows2, nbows2, prep2)
    jax.block_until_ready(out2)
    ref2 = etm_forward_ref(bows2, nbows2, params2)
    assert jnp.allclose(out2[0], ref2[0], rtol=1e-4, atol=1e-4), (out2[0], ref2[0])
    assert jnp.allclose(out2[1], ref2[1], rtol=1e-4, atol=1e-4), (out2[1], ref2[1])

    print("KERNEL_OK")
</pallas_src>

<mosaic_0001>
module attributes {stable_mosaic.version = 11 : i64} {
  func.func @beta_logits_kernel(%arg0: i32, %arg1: i32, %arg2: memref<16x64xf32, #tpu.memory_space<vmem>>, %arg3: memref<64x128xf32, #tpu.memory_space<vmem>>, %arg4: memref<16x128xf32, #tpu.memory_space<vmem>>, %arg5: memref<16x1xf32, #tpu.memory_space<vmem>>, %arg6: memref<16x1xf32, #tpu.memory_space<vmem>>, %arg7: memref<16x1xf32, #tpu.memory_space<vmem>>, %arg8: memref<16x1xf32, #tpu.memory_space<vmem>>) attributes {dimension_semantics = [#tpu.dimension_semantics<parallel>, #tpu.dimension_semantics<arbitrary>], iteration_bounds = array<i64: 2, 2>, scalar_prefetch = 0 : i64, scratch_operands = 2 : i64, tpu.core_type = #tpu.core_type<tc>, window_params = [{pipeline_mode = #tpu.pipeline_mode<synchronous>, transform_indices = @transform_0, window_bounds = array<i64: 16, 64>}, {transform_indices = @transform_1, window_bounds = array<i64: 64, 128>}, {transform_indices = @transform_2, window_bounds = array<i64: 16, 128>}, {transform_indices = @transform_3, window_bounds = array<i64: 16, 1>}, {transform_indices = @transform_4, window_bounds = array<i64: 16, 1>}]} {
    %c0_i32 = arith.constant 0 : i32
    %0 = arith.cmpi eq, %arg1, %c0_i32 : i32
    %1 = arith.extui %0 : i1 to i32
    %c0_i32_0 = arith.constant 0 : i32
    %2 = arith.cmpi ne, %1, %c0_i32_0 : i32
    scf.if %2 {
      %cst_17 = arith.constant 0xFF800000 : f32
      %26 = vector.broadcast %cst_17 : f32 to vector<16x1xf32>
      %c0_18 = arith.constant 0 : index
      %c0_19 = arith.constant 0 : index
      %27 = vector.load %arg7[%c0_18, %c0_19] : memref<16x1xf32, #tpu.memory_space<vmem>>, vector<16x1xf32>
      tpu.vector_store %arg7[%c0_18, %c0_19], %26 {strides = array<i32>} : memref<16x1xf32, #tpu.memory_space<vmem>>, vector<16x1xf32>,
      %cst_20 = arith.constant 0.000000e+00 : f32
      %28 = vector.broadcast %cst_20 : f32 to vector<16x1xf32>
      %c0_21 = arith.constant 0 : index
      %c0_22 = arith.constant 0 : index
      %29 = vector.load %arg8[%c0_21, %c0_22] : memref<16x1xf32, #tpu.memory_space<vmem>>, vector<16x1xf32>
      tpu.vector_store %arg8[%c0_21, %c0_22], %28 {strides = array<i32>} : memref<16x1xf32, #tpu.memory_space<vmem>>, vector<16x1xf32>,
    } else {
    }
    %c0 = arith.constant 0 : index
    %c0_1 = arith.constant 0 : index
    %3 = vector.load %arg2[%c0, %c0_1] : memref<16x64xf32, #tpu.memory_space<vmem>>, vector<16x64xf32>
    %c0_2 = arith.constant 0 : index
    %c0_3 = arith.constant 0 : index
    %4 = vector.load %arg3[%c0_2, %c0_3] : memref<64x128xf32, #tpu.memory_space<vmem>>, vector<64x128xf32>
    %cst = arith.constant dense<0.000000e+00> : vector<16x128xf32>
    %5 = tpu.matmul %3, %4, %cst {dimension_numbers = #tpu.dot_dimension_numbers<[1], [0], [0], [1], [0, 0, 1, 1], [], []>} : vector<16x64xf32>, vector<64x128xf32>, vector<16x128xf32> -> vector<16x128xf32>
    %c0_4 = arith.constant 0 : index
    %c0_5 = arith.constant 0 : index
    %6 = vector.load %arg4[%c0_4, %c0_5] : memref<16x128xf32, #tpu.memory_space<vmem>>, vector<16x128xf32>
    tpu.vector_store %arg4[%c0_4, %c0_5], %5 {strides = array<i32>} : memref<16x128xf32, #tpu.memory_space<vmem>>, vector<16x128xf32>,
    %c0_6 = arith.constant 0 : index
    %c0_7 = arith.constant 0 : index
    %7 = vector.load %arg7[%c0_6, %c0_7] : memref<16x1xf32, #tpu.memory_space<vmem>>, vector<16x1xf32>
    %cst_8 = arith.constant dense<0xFF800000> : vector<16xf32>
    %8 = vector.multi_reduction <maximumf>, %5, %cst_8 [1] : vector<16x128xf32> to vector<16xf32>
    %9 = vector.shape_cast %8 : vector<16xf32> to vector<16x1xf32>
    %10 = arith.maximumf %7, %9 : vector<16x1xf32>
    %c0_9 = arith.constant 0 : index
    %c0_10 = arith.constant 0 : index
    %11 = vector.load %arg8[%c0_9, %c0_10] : memref<16x1xf32, #tpu.memory_space<vmem>>, vector<16x1xf32>
    %12 = arith.subf %7, %10 : vector<16x1xf32>
    %13 = math.exp %12 : vector<16x1xf32>
    %14 = arith.mulf %11, %13 : vector<16x1xf32>
    %15 = vector.broadcast %10 : vector<16x1xf32> to vector<16x128xf32>
    %16 = arith.subf %5, %15 : vector<16x128xf32>
    %17 = math.exp %16 : vector<16x128xf32>
    %cst_11 = arith.constant dense<0.000000e+00> : vector<16xf32>
    %18 = vector.multi_reduction <add>, %17, %cst_11 [1] : vector<16x128xf32> to vector<16xf32>
    %19 = vector.shape_cast %18 : vector<16xf32> to vector<16x1xf32>
    %20 = arith.addf %14, %19 : vector<16x1xf32>
    %c0_12 = arith.constant 0 : index
    %c0_13 = arith.constant 0 : index
    %21 = vector.load %arg8[%c0_12, %c0_13] : memref<16x1xf32, #tpu.memory_space<vmem>>, vector<16x1xf32>
    tpu.vector_store %arg8[%c0_12, %c0_13], %20 {strides = array<i32>} : memref<16x1xf32, #tpu.memory_space<vmem>>, vector<16x1xf32>,
    %c0_14 = arith.constant 0 : index
    %c0_15 = arith.constant 0 : index
    %22 = vector.load %arg7[%c0_14, %c0_15] : memref<16x1xf32, #tpu.memory_space<vmem>>, vector<16x1xf32>
    tpu.vector_store %arg7[%c0_14, %c0_15], %10 {strides = array<i32>} : memref<16x1xf32, #tpu.memory_space<vmem>>, vector<16x1xf32>,
    %c1_i32 = arith.constant 1 : i32
    %23 = arith.cmpi eq, %arg1, %c1_i32 : i32
    %24 = arith.extui %23 : i1 to i32
    %c0_i32_16 = arith.constant 0 : i32
    %25 = arith.cmpi ne, %24, %c0_i32_16 : i32
    scf.if %25 {
      %c0_17 = arith.constant 0 : index
      %c0_18 = arith.constant 0 : index
      %26 = vector.load %arg7[%c0_17, %c0_18] : memref<16x1xf32, #tpu.memory_space<vmem>>, vector<16x1xf32>
      %c0_19 = arith.constant 0 : index
      %c0_20 = arith.constant 0 : index
      %27 = vector.load %arg5[%c0_19, %c0_20] : memref<16x1xf32, #tpu.memory_space<vmem>>, vector<16x1xf32>
      tpu.vector_store %arg5[%c0_19, %c0_20], %26 {strides = array<i32>} : memref<16x1xf32, #tpu.memory_space<vmem>>, vector<16x1xf32>,
      %c0_21 = arith.constant 0 : index
      %c0_22 = arith.constant 0 : index
      %28 = vector.load %arg8[%c0_21, %c0_22] : memref<16x1xf32, #tpu.memory_space<vmem>>, vector<16x1xf32>
      %c0_23 = arith.constant 0 : index
      %c0_24 = arith.constant 0 : index
      %29 = vector.load %arg6[%c0_23, %c0_24] : memref<16x1xf32, #tpu.memory_space<vmem>>, vector<16x1xf32>
      tpu.vector_store %arg6[%c0_23, %c0_24], %28 {strides = array<i32>} : memref<16x1xf32, #tpu.memory_space<vmem>>, vector<16x1xf32>,
    } else {
    }
    return
  }
  func.func @transform_0(%arg0: i32, %arg1: i32) -> (i32, i32) {
    %c0_i32 = arith.constant 0 : i32
    %c0_i32_0 = arith.constant 0 : i32
    %c0_i32_1 = arith.constant 0 : i32
    return %c0_i32, %c0_i32_0 : i32, i32
  }
  func.func @transform_1(%arg0: i32, %arg1: i32) -> (i32, i32) {
    %c2_i32 = arith.constant 2 : i32
    %0 = arith.muli %arg0, %c2_i32 : i32
    %1 = arith.addi %0, %arg1 : i32
    %c0_i32 = arith.constant 0 : i32
    %c0_i32_0 = arith.constant 0 : i32
    return %c0_i32, %1 : i32, i32
  }
  func.func @transform_2(%arg0: i32, %arg1: i32) -> (i32, i32) {
    %c2_i32 = arith.constant 2 : i32
    %0 = arith.muli %arg0, %c2_i32 : i32
    %1 = arith.addi %0, %arg1 : i32
    %c0_i32 = arith.constant 0 : i32
    %c0_i32_0 = arith.constant 0 : i32
    return %c0_i32, %1 : i32, i32
  }
  func.func @transform_3(%arg0: i32, %arg1: i32) -> (i32, i32) {
    %c0_i32 = arith.constant 0 : i32
    %c0_i32_0 = arith.constant 0 : i32
    return %arg0, %c0_i32 : i32, i32
  }
  func.func @transform_4(%arg0: i32, %arg1: i32) -> (i32, i32) {
    %c0_i32 = arith.constant 0 : i32
    %c0_i32_0 = arith.constant 0 : i32
    return %arg0, %c0_i32 : i32, i32
  }
}

</mosaic_0001>

<bundles_post_ra>
// kernel: tpu_custom_call.1
= control target key start
LH: loop header
LB: loop body
LE: loop exit
PB: predicated region body
PF: predicated region fallthrough
CT: control target
= control target key end

     0   :  { %s1300_s0 = inlined_call_operand.hbm [shape: f32[16,64], index: 0, kind: input, shape index: {}]   ;;  %s1301_s1 = inlined_call_operand.hbm [shape: f32[64,512], index: 1, kind: input, shape index: {}]   ;;  %s1302_s2 = inlined_call_operand.hbm [shape: f32[16,512], index: 2, kind: output, shape index: {0}]   ;;  %s1303_s3 = inlined_call_operand.vmem [shape: f32[32,1], index: 3, kind: output, shape index: {1}]   ;;  %s1304_s4 = inlined_call_operand.vmem [shape: f32[32,1], index: 4, kind: output, shape index: {2}]  }
   0x1   :  { %1316 = sst [smem:[#allocation16_spill]] %s1300_s0 }
   0x2   :  { %10 = vsyncpa [#allocation5], 0 }
   0x3   :  { %11 = vsyncpa [#allocation8], 0 }
   0x4   :  { %13 = vsyncpa [#allocation8 + $0x1], 0 }
   0x5   :  { %14 = vsyncpa [#allocation6], 0 }
   0x6   :  { %16 = vsyncpa [#allocation6 + $0x1], 0  ;;  %s1007_s15 = smov 0   ;;  %s1009_s16 = smov 0  }
   0x7   :  { %s1011_s17 = smov 0   ;;  %s1013_s18 = smov 0  }
   0x8   :  { %s1015_s19 = smov 0   ;;  %s1017_s20 = smov 0  }
   0x9   :  { %s1019_s21 = smov 0   ;;  %s1021_s22 = smov 0  }
   0xa LB: > { %1317 = sst [smem:[#allocation13_spill]] %s940_s15  ;;  %s626_s23 = sadd.s32 4294967295, %s968_s22   ;;  %s968_s22 = sphi %s1021_s22, %s22_s22   ;;  %s964_s21 = sphi %s1019_s21, %s1346_s21   ;;  %s960_s20 = sphi %s1017_s20, %s1345_s20   ;;  %s956_s19 = sphi %s1015_s19, %s1340_s19   ;;  %s952_s18 = sphi %s1013_s18, %s1344_s18   ;;  %s948_s17 = sphi %s1011_s17, %s1343_s17   ;;  %s944_s16 = sphi %s1009_s16, %s1342_s16   ;;  %s940_s15 = sphi %s1007_s15, %s1341_s15  }
   0xb   : > { %1318 = sst [smem:[#allocation14_spill]] %s964_s21  ;;  %s627_s24 = sadd.s32 4294967294, %s968_s22  }
   0xc   : > { %p73_p0 = scmp.ne.s32.totalorder %s948_s17, %s944_s16  ;;  %p74_p1 = scmp.eq.s32.totalorder %s968_s22, 0 }
   0xd   : > { %p79_p2 = scmp.ne.s32.totalorder %s944_s16, %s940_s15  ;;  %p1054_p3 = scmp.eq.s32.totalorder %s626_s23, 0 }
   0xe   : > { %p1058_p4 = por %p74_p1, %p73_p0  ;;  %p107_p5 = scmp.eq.s32.totalorder %s626_s23, 3 }
   0xf   : > { %s1319_s25 = scalar_select %p1054_p3, 1, 0 }
  0x10   : > { %p1064_p6 = por %p1054_p3, %p79_p2  ;;  %p113_p7 = scmp.eq.s32.totalorder %s627_s24, 3 }
  0x11   : > { %p1068_p8 = por %p107_p5, %p73_p0  ;;  %p632_p9 = scmp.ge.s32.totalorder %s968_s22, 1 }
  0x12   : > { %s1321_s27 = scalar_select %p1064_p6, 1, 0 }
  0x13   : > { %s1322_s28 = scalar_select %p1068_p8, 1, 0 }
  0x14   : > { %p1073_p10 = por %p113_p7, %p79_p2  ;;  %p172_p11 = scmp.lt.s32.totalorder %s968_s22, 5 }
  0x15   : > { %s970_s5 = smov [#allocation4]   ;;  %p721_p0 = scmp.lt.s32.totalorder %s968_s22, 4 }
  0x16   : > { %s1323_s29 = scalar_select %p1073_p10, 1, 0 }
  0x17   : > { %p1078_p12 = pnand %p632_p9, %p172_p11  ;;  %s184_s6 = sshll.u32 %s970_s5, 4  ;;  %s185_s6 = int_to_ptr.vmem [resolvable:$true] %s184_s6 }
  0x18   : > { %1324 = sst [smem:[#allocation15_spill]] %s1323_s29  ;;  %p1093_p2 = pnand %p721_p0, %p1058_p4 }
  0x19   : > { %s1325_s30 = scalar_select %p1078_p12, 1, 0 }
  0x1a   : > { %p708_p13 = pneg %p1078_p12  ;;  %s1328_s0 = sld [smem:[#allocation16_spill]] }
  0x1b   : > { %s1327_s8 = scalar_select %p1093_p2, 1, 0 }
  0x1c   : > { %p1087_p1 = pnand %p708_p13, %p1054_p3 }
  0x1e   : > { %p810_p7 = pneg %p1087_p1 }
  0x20   : > { %s808_s11 = scalar_lea.hbm %s1328_s0, 256 }
  0x21   : > { %p809_p5 = scmp.ne.s32.totalorder %s1328_s0, %s808_s11  ;;  %p815_p13 = scmp.lt.u32.totalorder %s808_s11, %s1328_s0 }
  0x23   : > { %p811_p9 = pnand %p810_p7, %p809_p5 }
  0x25   : > { %p812_p11 = pneg %p811_p9 }
  0x27   : > { %p817_p4 = pnand %p815_p13, %p812_p11 }
  0x29   : > { %820 = shalt.err (!%p817_p4)
}
  0x2a   : > { %s821_s24 = scalar_lea.vmem %s185_s6, 256  ;;  %p829_p6 = scmp.lt.s32.totalorder %s185_s6, %s185_s6 }
  0x2b   : > { %p822_p0 = scmp.ne.s32.totalorder %s185_s6, %s821_s24  ;;  %p830_p3 = scmp.lt.s32.totalorder %s821_s24, %s821_s24 }
  0x2d   : > { %p824_p10 = pnand %p822_p0, %p810_p7  ;;  %p831_p12 = por %p830_p3, %p829_p6 }
  0x2f   : > { %p825_p8 = pneg %p824_p10 }
  0x31   : > { %p832_p2 = pnand %p831_p12, %p825_p8 }
  0x33   : > { %835 = shalt.err (!%p832_p2)
}
  0x34   : > { %s1313_s26 = smov 128   ;;  %s1314_s5 = smov 8  }
  0x35   : > { %711 = dma.hbm_to_vmem [thread:$0]  (!%p1087_p1), %s1328_s0, 256, %s185_s6, [#allocation5], %s1313_s26, %s1313_s26, %s1314_s5  }
  0x36   : > { %s31_s11 = sadd.s32 1, %s960_s20  ;;  %s34_s12 = sadd.s32 1, %s964_s21 }
  0x37   : > { %p32_p3 = scmp.ge.s32.totalorder %s31_s11, 2  ;;  %s628_s13 = sshll.u32 %s964_s21, 1 }
  0x38   : > { %s60_s14 = sadd.s32 %s960_s20, %s628_s13  ;;  %s198_s23 = sand.u32 1, %s948_s17  }
  0x39   : > { %s1348_s11 = smov (%p32_p3, %s31_s11), 0  ;;  %s1350_s12 = smov (!%p32_p3, %s34_s12), %s964_s21 }
  0x3a   : > { %s637_s24 = sshll.u32 %s60_s14, 7  ;;  %p36_p6 = scmp.ge.s32.totalorder %s1350_s12, 2 }
  0x3b   : > { %s635_s7 = sshll.u32 %s198_s23, 6  ;;  %s1127_s6 = scalar_lea.hbm %s1301_s1, %s637_s24 }
  0x3c   : > { %s1352_s12 = smov (%p36_p6, %s1350_s12), 0  ;;  %s202_s10 = scalar_lea.vmem [#allocation7], %s635_s7 }
  0x3d   : > { %s629_s9 = sshll.u32 %s1352_s12, 1  ;;  %s210_s13 = sshll.u32 %s202_s10, 4  ;;  %s1133_s13 = int_to_ptr.vmem [resolvable:$true] %s210_s13 }
  0x3e   : > { %s62_s26 = sadd.s32 %s629_s9, %s1348_s11  ;;  %s66_s0 = sadd.s32 1, %s948_s17 }
  0x3f   : > { %s63_s5 = ssub.s32 %s60_s14, %s62_s26  ;;  %s1140_s15 = scalar_lea.sflag [#allocation8], %s198_s23 }
  0x40   : > { %p1136_p8 = scmp.eq.s32.totalorder %s63_s5, 0  ;;  %s836_s29 = scalar_lea.hbm %s1127_s6, 1024 }
  0x41   : > { %p837_p10 = scmp.ne.s32.totalorder %s1127_s6, %s836_s29  ;;  %p1330_p12 = scmp.ne.s32.totalorder %s1327_s8, 0 }
  0x42   : > { %s841_s9 = scalar_lea.hbm %s1301_s1, 4096  ;;  %p842_p7 = scmp.lt.u32.totalorder %s1127_s6, %s1301_s1 }
  0x43   : > { %p838_p1 = pneg %p1330_p12  ;;  %p843_p9 = scmp.lt.u32.totalorder %s841_s9, %s836_s29 }
  0x44   : > { %p845_p13 = scmp.lt.u32.totalorder %s836_s29, %s1127_s6 }
  0x45   : > { %p839_p2 = pnand %p838_p1, %p837_p10  ;;  %p844_p11 = por %p843_p9, %p842_p7 }
  0x47   : > { %p840_p5 = pneg %p839_p2  ;;  %p846_p4 = por %p845_p13, %p844_p11 }
  0x49   : > { %p847_p0 = pnand %p846_p4, %p840_p5 }
  0x4b   : > { %850 = shalt.err (!%p847_p0)
}
  0x4c   : > { %s851_s5 = scalar_lea.vmem %s1133_s13, 1024  ;;  %s973_s23 = smov [#allocation7]  }
  0x4d   : > { %p852_p3 = scmp.ne.s32.totalorder %s1133_s13, %s851_s5  ;;  %s856_s10 = sshll.u32 %s973_s23, 4  ;;  %s857_s10 = int_to_ptr.vmem [resolvable:$false] %s856_s10 }
  0x4e   : > { %s858_s24 = scalar_lea.vmem %s857_s10, 2048  ;;  %p859_p2 = scmp.lt.s32.totalorder %s1133_s13, %s857_s10 }
  0x4f   : > { %p854_p6 = pnand %p852_p3, %p838_p1  ;;  %p860_p7 = scmp.lt.s32.totalorder %s858_s24, %s851_s5 }
  0x51   : > { %p855_p10 = pneg %p854_p6  ;;  %p861_p9 = por %p860_p7, %p859_p2 }
  0x53   : > { %p862_p11 = pnand %p861_p9, %p855_p10 }
  0x55   : > { %865 = shalt.err (!%p862_p11)
}
  0x56   : > { %s974_s29 = smov 512   ;;  %s1331_s7 = smov 8  }
  0x57   : > { %s1332_s9 = smov 128   ;;  %p1333_p1 = scmp.ne.s32.totalorder %s1325_s30, 0 }
  0x58   : > { %715 = dma.hbm_to_vmem [thread:$0]  (!%p1330_p12), %s1127_s6, 1024, %s1133_s13, %s1140_s15, %s974_s29, %s1332_s9, %s1331_s7  }
  0x59   : > { %s1175_s26 = scalar_select %p1136_p8, %s948_s17, %s66_s0  }
  0x5a   : > { %222 = sbr.rel (%p1333_p1) target bundleno = 817 (0x331), region = 28  ;;  %p1334_p5 = scmp.ne.s32.totalorder (!%p1333_p1), %s1319_s25, 0 }
  0x61   : > { %927 = dma.done.wait (%p1334_p5), [#allocation5], 256  }
  0x62   : > { %929 = vsyncadd (%p1334_p5), [#allocation5], 4294967040  ;;  %s1184_s8 = sand.u32 1, %s944_s16   ;;  %p1335_p8 = scmp.ne.s32.totalorder %s1321_s27, 0 }
  0x63   : > { %s640_s6 = sshll.u32 %s1184_s8, 6  ;;  %s229_s13 = scalar_lea.sflag [#allocation8], %s1184_s8 }
  0x64   : > { %s1188_s21 = scalar_lea.vmem [#allocation7], %s640_s6 }
  0x65   : > { %931 = dma.done.wait (%p1335_p8), %s229_s13, 1024  }
  0x66   : > { %933 = vsyncadd (%p1335_p8), %s229_s13, 4294966272  ;;  %s641_s0 = sshll.u32 %s1184_s8, 4  ;;  %s1196_s25 = sshll.u32 %s956_s19, 1 }
  0x67   : > { %p272_p12 = scmp.lt.s32.totalorder %s1196_s25, 3  ;;  %s1210_s29 = scalar_lea.vmem [#allocation9], %s641_s0 }
  0x68   : > { %p646_p13 = scmp.ne.s32.totalorder %s952_s18, 0 }
  0x69   : > { %s273_s30 = scalar_select %p272_p12, %s1196_s25, 3 }
  0x6a   : > { %286 = sbr.rel (%p646_p13) target bundleno = 113 (0x71), region = 40  ;;  %vm287_vm0 = vcmask (!%p646_p13), 7168   ;;  %v975_v0 = vmov (!%p646_p13), -inf   ;;  %v976_v1 = vmov (!%p646_p13), 0.0  }
  0x6b   : > { %s643_s15 = sshll.u32 %s273_s30, 3  ;;  %288 = vst.msk [vmem:[#allocation2] sm:$0xff] (!%p646_p13), %vm287_vm0, %v975_v0  ;;  %289 = vst.msk [vmem:[#allocation2 + $0x8] sm:$0xff] (!%p646_p13), %vm287_vm0, %v975_v0 }
  0x6c   : > { %s1203_s23 = scalar_lea.vmem %s1303_s3, %s643_s15  ;;  %s1208_s27 = scalar_lea.vmem %s1304_s4, %s643_s15  ;;  %290 = vst.msk [vmem:[#allocation3] sm:$0xff] (!%p646_p13), %vm287_vm0, %v976_v1  ;;  %291 = vst.msk [vmem:[#allocation3 + $0x8] sm:$0xff] (!%p646_p13), %vm287_vm0, %v976_v1 }
  0x71 PF: > { %v294_v2 = vld [vmem:[%s1188_s21] sm:$0xff]  ;;  %v295_v3 = vld [vmem:[%s1188_s21 + $0x8] sm:$0xff]  ;;  %v296_v4 = vld [vmem:[%s1188_s21 + $0x10] sm:$0xff]  ;;  %vm302_vm1 = vcmask 523264   ;;  %v977_v18 = vmov 0   ;;  %vm426_vm2 = vcmask 7168  }
  0x72   : > { %v684_v5 = vpack.c.bf16 %v295_v3, %v294_v2  ;;  %v297_v6 = vld [vmem:[%s1188_s21 + $0x18] sm:$0xff]  ;;  %v298_v8 = vld [vmem:[%s1188_s21 + $0x20] sm:$0xff]  ;;  %v299_v9 = vld [vmem:[%s1188_s21 + $0x28] sm:$0xff]  ;;  %798 = vset.pattern.permute.xlu1 %v977_v18  ;;  %799 = vset.pattern.permute.xlu0 %v977_v18  ;;  %p649_p4 = scmp.ne.s32.totalorder %s952_s18, 1 }
  0x73   : > { %v688_v7 = vpack.c.bf16 %v297_v6, %v296_v4  ;;  %v292_v10 = vld [vmem:[#allocation4] sm:$0xff]  ;;  %v692_v11 = vpack.c.bf16 %v299_v9, %v298_v8  ;;  %v301_v13 = vld [vmem:[%s1188_s21 + $0x38] sm:$0xff]  ;;  %v394_v38 = vld [vmem:[#allocation3] sm:$0xff] }
  0x74   : > { %685 = vmatprep.subr.bf16.mxu0 %v684_v5  ;;  %681 = vmatprep.mubr.msk.f32.mxu0 %vm302_vm1, %v292_v10  ;;  %v300_v12 = vld [vmem:[%s1188_s21 + $0x30] sm:$0xff]  ;;  %v293_v15 = vld [vmem:[#allocation4 + $0x8] sm:$0xff]  ;;  %v395_v42 = vld [vmem:[#allocation3 + $0x8] sm:$0xff] }
  0x75   : > { %687 = vmatpush3.bf16.msra.mxu0 %v684_v5  ;;  %v696_v14 = vpack.c.bf16 %v301_v13, %v300_v12  ;;  %v386_v19 = vld [vmem:[#allocation2] sm:$0xff]  ;;  %v387_v22 = vld [vmem:[#allocation2 + $0x8] sm:$0xff] }
  0x76   : > { %689 = vmatprep.subr.bf16.mxu0 %v688_v7 }
  0x79   : > { %691 = vmatpush3.bf16.msra.mxu0 %v688_v7 }
  0x7a   : > { %693 = vmatprep.subr.bf16.mxu0 %v692_v11 }
  0x7d   : > { %695 = vmatpush3.bf16.msra.mxu0 %v692_v11 }
  0x7e   : > { %697 = vmatprep.subr.bf16.mxu0 %v696_v14 }
  0x81   : > { %699 = vmatpush3.bf16.msra.mxu0 %v696_v14 }
  0x84   : > { %682 = vmatmul.mubr.msk.f32.vlgmr.msra.gmra.mrb[0].mxu0 %vm302_vm1, %v293_v15 }
 0x157   : > { %v683_v16 = vpop.f32.mrb[0].mxu0 }
 0x158   : > { %385 = vst [vmem:[%s1210_s29 + $0x8] sm:$0xff] %v683_v16  ;;  %v375_v17 = vpop.f32.mrb[1].mxu0 }
 0x159   : > { %384 = vst [vmem:[%s1210_s29] sm:$0xff] %v375_v17  ;;  %388 = vmax.xlane.f32.xlu0 %v375_v17 }
 0x15d   : > { %390 = vmax.xlane.f32.xlu0 %v683_v16 }
 0x1e6   : > { %v389_v20 = vpop.xlane.xlu0 %388 }
 0x1e7   : > { %v392_v21 = vmax.f32 %v386_v19, %v389_v20 }
 0x1e9   : > { %v396_v23 = vsub.f32 %v386_v19, %v392_v21  ;;  %429 = vst.msk [vmem:[#allocation2] sm:$0xff] %vm426_vm2, %v392_v21  ;;  %406 = vperm.xlu1 %798, %v392_v21  }
 0x1ea   : > { %v391_v24 = vpop.xlane.xlu0 %390 }
 0x1eb   : > { %v393_v25 = vmax.f32 %v387_v22, %v391_v24  ;;  %v398_v35 = vmul.f32 1.442695, %v396_v23 }
 0x1ed   : > { %v397_v26 = vsub.f32 %v387_v22, %v393_v25  ;;  %430 = vst.msk [vmem:[#allocation2 + $0x8] sm:$0xff] %vm426_vm2, %v393_v25  ;;  %411 = vperm.xlu1 %798, %v393_v25  }
 0x1ef   : > { %v400_v36 = vmul.f32 1.442695, %v397_v26 }
 0x1f0   : > { %v435_v47 = vld [vmem:[#allocation2] sm:$0xff] (!%p649_p4) }
 0x1f1   : > { %437 = vst.msk [vmem:[%s1203_s23] sm:$0xff] (!%p649_p4), %vm426_vm2, %v435_v47 }
 0x1f4   : > { %v436_v49 = vld [vmem:[#allocation2 + $0x8] sm:$0xff] (!%p649_p4) }
 0x1f5   : > { %438 = vst.msk [vmem:[%s1203_s23 + $0x8] sm:$0xff] (!%p649_p4), %vm426_vm2, %v436_v49 }
 0x268   : > { %v407_v27 = vpop.permute.xlu1 %406 }
 0x269   : > { %v414_v28 = vsub.f32 %v375_v17, %v407_v27 }
 0x26b   : > { %v416_v29 = vmul.f32 1.442695, %v414_v28 }
 0x26c   : > { %v412_v30 = vpop.permute.xlu1 %411 }
 0x26d   : > { %800 = vpow2.f32 %v416_v29  ;;  %v415_v31 = vsub.f32 %v683_v16, %v412_v30 }
 0x26f   : > { %v418_v32 = vmul.f32 1.442695, %v415_v31 }
 0x271   : > { %802 = vpow2.f32 %v418_v32 }
 0x272   : > { %804 = vpow2.f32 %v398_v35 }
 0x273   : > { %806 = vpow2.f32 %v400_v36 }
 0x277   : > { %v801_v33 = vpop.eup %800 }
 0x278   : > { %420 = vadd.xlane.f32.xlu0 %v801_v33 }
 0x27b   : > { %v803_v34 = vpop.eup %802 }
 0x27c   : > { %422 = vadd.xlane.f32.xlu1 %v803_v34  ;;  %v805_v37 = vpop.eup %804 }
 0x27d   : > { %v402_v39 = vmul.f32 %v805_v37, %v394_v38  ;;  %v807_v40 = vpop.eup %806 }
 0x27e   : > { %v403_v44 = vmul.f32 %v807_v40, %v395_v42 }
 0x305   : > { %v421_v41 = vpop.xlane.xlu0 %420 }
 0x306   : > { %v424_v43 = vadd.f32 %v421_v41, %v402_v39  ;;  %434 = sbr.rel (%p649_p4) target bundleno = 789 (0x315), region = 44 }
 0x308   : > { %427 = vst.msk [vmem:[#allocation3] sm:$0xff] %vm426_vm2, %v424_v43 }
 0x309   : > { %v423_v45 = vpop.xlane.xlu1 %422 }
 0x30a   : > { %v425_v46 = vadd.f32 %v423_v45, %v403_v44 }
 0x30c   : > { %428 = vst.msk [vmem:[#allocation3 + $0x8] sm:$0xff] %vm426_vm2, %v425_v46 }
 0x30f   : > { %v439_v48 = vld [vmem:[#allocation3] sm:$0xff] }
 0x310   : > { %441 = vst.msk [vmem:[%s1208_s27] sm:$0xff] %vm426_vm2, %v439_v48 }
 0x313   : > { %v440_v50 = vld [vmem:[#allocation3 + $0x8] sm:$0xff] }
 0x314   : > { %442 = vst.msk [vmem:[%s1208_s27 + $0x8] sm:$0xff] %vm426_vm2, %v440_v50 }
 0x315 PF: > { %s462_s19 = sadd.s32 %s952_s18, %s1196_s25  ;;  %s468_s9 = sshll.u32 %s1210_s29, 4  ;;  %s1246_s9 = int_to_ptr.vmem [resolvable:$true] %s468_s9 }
 0x316   : > { %s652_s7 = sshll.u32 %s462_s19, 7  ;;  %s444_s0 = scalar_lea.sflag [#allocation6], %s1184_s8 }
 0x317   : > { %s1244_s21 = scalar_lea.hbm %s1302_s2, %s652_s7  ;;  %s866_s30 = scalar_lea.vmem %s1246_s9, 256 }
 0x318   : > { %p867_p0 = scmp.ne.s32.totalorder %s1246_s9, %s866_s30  ;;  %p1336_p3 = scmp.ne.s32.totalorder %s1322_s28, 0 }
 0x319   : > { %s978_s15 = smov [#allocation9]  }
 0x31a   : > { %p868_p6 = pnand %p867_p0, %p1336_p3  ;;  %s870_s18 = sshll.u32 %s978_s15, 4  ;;  %s871_s18 = int_to_ptr.vmem [resolvable:$false] %s870_s18 }
 0x31b   : > { %s872_s25 = scalar_lea.vmem %s871_s18, 512  ;;  %p873_p2 = scmp.lt.s32.totalorder %s1246_s9, %s871_s18 }
 0x31c   : > { %p869_p10 = pneg %p868_p6  ;;  %p874_p7 = scmp.lt.s32.totalorder %s872_s25, %s866_s30 }
 0x31e   : > { %p875_p9 = por %p874_p7, %p873_p2 }
 0x320   : > { %p876_p11 = pnand %p875_p9, %p869_p10 }
 0x322   : > { %879 = shalt.err (!%p876_p11)
}
 0x323   : > { %s880_s14 = scalar_lea.hbm %s1244_s21, 256  ;;  %s884_s10 = scalar_lea.hbm %s1302_s2, 1024 }
 0x324   : > { %p881_p1 = scmp.ne.s32.totalorder %s1244_s21, %s880_s14  ;;  %p885_p12 = scmp.lt.u32.totalorder %s1244_s21, %s1302_s2 }
 0x325   : > { %p886_p13 = scmp.lt.u32.totalorder %s884_s10, %s880_s14  ;;  %p888_p0 = scmp.lt.u32.totalorder %s880_s14, %s1244_s21 }
 0x326   : > { %p882_p5 = pnand %p881_p1, %p1336_p3 }
 0x327   : > { %p887_p4 = por %p886_p13, %p885_p12 }
 0x328   : > { %p883_p8 = pneg %p882_p5 }
 0x329   : > { %p889_p6 = por %p888_p0, %p887_p4 }
 0x32b   : > { %p890_p10 = pnand %p889_p6, %p883_p8 }
 0x32d   : > { %893 = shalt.err (!%p890_p10)
}
 0x32e   : > { %s979_s29 = smov 128   ;;  %s980_s19 = smov 512  }
 0x32f   : > { %s981_s7 = smov 8  }
 0x330   : > { %706 = dma.vmem_to_hbm [thread:$0]  (%p1336_p3), %s1246_s9, 256, %s1244_s21, %s444_s0, %s979_s29, %s980_s19, %s981_s7  }
 0x331 PF: > { %s1337_s6 = sld [smem:[#allocation13_spill]]  ;;  %s1338_s13 = sld [smem:[#allocation15_spill]] }
 0x332   : > { %p723_p2 = scmp.ge.s32.totalorder %s968_s22, 2 }
 0x337   : > { %s491_s30 = sand.u32 1, %s1337_s6   ;;  %p1339_p7 = scmp.ne.s32.totalorder %s1338_s13, 0 }
 0x338   : > { %s492_s15 = scalar_lea.sflag [#allocation6], %s491_s30 }
 0x339   : > { %p717_p9 = pnand %p723_p2, %p1339_p7 }
 0x33b   : > { %935 = dma.done.wait (!%p717_p9), %s492_s15, 256  }
 0x33c   : > { %937 = vsyncadd (!%p717_p9), %s492_s15, 4294967040  ;;  %s22_s22 = sadd.s32 1, %s968_s22   ;;  %s1340_s19 = sld [smem:[#allocation14_spill]] }
 0x33d   : > { %p19_p11 = scmp.ge.s32.totalorder %s22_s22, 6   ;;  %s1341_s15 = smov %s944_s16 }
 0x33e   : > { %s1342_s16 = smov %s948_s17  ;;  %s1343_s17 = smov %s1175_s26 }
 0x33f   : > { %s1344_s18 = smov %s960_s20  ;;  %s1345_s20 = smov %s1348_s11 }
 0x340   : > { %s1346_s21 = smov %s1352_s12  ;;  %21 = sbr.rel (!%p19_p11) target bundleno = 10 (0xa), region = 110 }
 0x347   :  { %513 = vsyncpa [#allocation5], 1 }
 0x348   :  { %515 = vsyncpa [#allocation5 + $0x1], 1 }
 0x349   :  { %516 = vsyncpa [#allocation8], 1 }
 0x34a   :  { %518 = vsyncpa [#allocation8 + $0x1], 1 }
 0x34b   :  { %519 = vsyncpa [#allocation6], 1 }
 0x34c   :  { %521 = vsyncpa [#allocation6 + $0x1], 1 }

</bundles_post_ra>
